<compile_context>
chip_gen: v6e
topology: v6e:2x2x1
jax: 0.10.0
libtpu: 0.0.40
codegen_flags: <defaults>
</compile_context>

<pallas_src>
import math
from functools import partial

import numpy as np
import jax
import jax.numpy as jnp
from jax.experimental import pallas as pl
from jax.experimental.pallas import tpu as pltpu

POOL_SIZES = (1, 2, 3, 6)
BN_EPS = 1e-5
SS_PAD = 128  # 1+4+9+36 = 50 pooled cells, padded to one full lane width


# ----------------------------------------------------------------------------
# Host-side glue: static pooling / upsampling matrices (constants under jit).
# ----------------------------------------------------------------------------
def adaptive_pool_matrix(in_size: int, out_size: int) -> np.ndarray:
    """P[o, i] so pooled[o] = sum_i P[o, i] * x[i] (PyTorch adaptive avg rule)."""
    P = np.zeros((out_size, in_size), dtype=np.float32)
    for o in range(out_size):
        start = (o * in_size) // out_size
        end = math.ceil((o + 1) * in_size / out_size)
        P[o, start:end] = 1.0 / (end - start)
    return P


def upsample_matrix(out_size: int, in_size: int) -> np.ndarray:
    """U[i, o] so up[i] = sum_o U[i, o] * y[o] (bilinear, align_corners=True)."""
    U = np.zeros((out_size, in_size), dtype=np.float32)
    if in_size == 1:
        U[:, 0] = 1.0
        return U
    for i in range(out_size):
        src = i * (in_size - 1) / (out_size - 1) if out_size > 1 else 0.0
        i0 = min(int(math.floor(src)), in_size - 1)
        frac = src - i0
        U[i, i0] += 1.0 - frac
        if frac > 0.0:
            U[i, min(i0 + 1, in_size - 1)] += frac
    return U


def _pick_tile(dim: int, cap: int, quantum: int) -> int:
    """Largest tile <= cap that divides `dim` and is a multiple of `quantum`.
    Falls back to `dim` (full extent is always layout-legal for that array)."""
    if dim <= cap:
        return dim
    t = (cap // quantum) * quantum
    while t >= quantum:
        if dim % t == 0:
            return t
        t -= quantum
    return dim


def _vmem_budget_bytes() -> int:
    """Per-generation scoped-VMEM budget (v7x ~48 MiB, v5e/v6e ~96 MiB)."""
    cap = 64 << 20
    try:
        info = pltpu.get_tpu_info()
        cap = int(getattr(info, "vmem_capacity_bytes", cap))
    except Exception:
        pass
    return max(32 << 20, min(int(0.75 * cap), 100 << 20))


# ----------------------------------------------------------------------------
# Kernel A: grid = (N, channel-tiles).  Streams x once per image:
#   - writes the passthrough channels of the final output,
#   - accumulates z = W_all @ (x @ M_all) over channel tiles,
#   - epilogue: z = relu(z + bias)   (bias folds BN shift + branch mask).
# ----------------------------------------------------------------------------
def _psp_reduce_kernel(x_ref, m_ref, w_ref, bias_ref, pass_ref, z_ref):
    c = pl.program_id(1)

    @pl.when(c == 0)
    def _init():
        z_ref[...] = jnp.zeros_like(z_ref)

    xt = x_ref[0]                                            # (c_tile, HW)
    pass_ref[0] = xt                                         # passthrough write
    pooled = jnp.dot(xt, m_ref[...],
                     preferred_element_type=jnp.float32)     # (c_tile, SS_PAD)
    z_ref[0] += jnp.dot(w_ref[...], pooled,
                        preferred_element_type=jnp.float32)  # (R, SS_PAD)

    @pl.when(c == pl.num_programs(1) - 1)
    def _finalize():
        z_ref[0] = jnp.maximum(z_ref[0] + bias_ref[...], 0.0)


# ----------------------------------------------------------------------------
# Kernel B: grid = (N, hw-tiles, r-tiles), all parallel.  feats = z @ B_all,
# written into the feature channels of the SAME buffer kernel A started
# (input_output_aliases), so no concat / second full-tensor copy.
# ----------------------------------------------------------------------------
def _psp_expand_kernel(z_ref, b_ref, alias_ref, o_ref):
    del alias_ref  # aliased full output buffer; passthrough already written
    o_ref[0] = jnp.dot(z_ref[0], b_ref[...], preferred_element_type=jnp.float32)


# ----------------------------------------------------------------------------
# Wrapper
# ----------------------------------------------------------------------------
@partial(jax.jit, static_argnames=("c_tile_cap", "r_tile_cap", "hw_tile_cap"))
def pyramid_pooling(x, conv_w, bn_gamma, bn_beta, bn_mean, bn_var,
                    *, c_tile_cap=None, r_tile_cap=None, hw_tile_cap=None):
    """x: (N, C, H, W) f32 NCHW. Returns (N, C + 4*(C//4), H, W) f32."""
    N, C, H, W = x.shape
    assert C % 4 == 0, "in_channels must be divisible by 4"
    nb = len(POOL_SIZES)
    Cout = C // 4
    R = nb * Cout                      # == C
    HW = H * W

    sizes = [s * s for s in POOL_SIZES]
    offs = np.cumsum([0] + sizes[:-1]).tolist()
    SS = sum(sizes)                    # 50

    # --- static pool / upsample matrices, concatenated over branches --------
    m_blocks, b_blocks = [], []
    for S in POOL_SIZES:
        Ph, Pw = adaptive_pool_matrix(H, S), adaptive_pool_matrix(W, S)
        Uh, Uw = upsample_matrix(H, S), upsample_matrix(W, S)
        m_blocks.append(np.kron(Ph, Pw).T)              # (HW, S^2)
        b_blocks.append(np.kron(Uh, Uw).T)              # (S^2, HW)
    m_all_np = np.zeros((HW, SS_PAD), np.float32)
    m_all_np[:, :SS] = np.concatenate(m_blocks, axis=1)
    b_all_np = np.zeros((SS_PAD, HW), np.float32)
    b_all_np[:SS, :] = np.concatenate(b_blocks, axis=0)
    mask_np = np.zeros((R, SS_PAD), np.float32)         # own-branch columns
    for k in range(nb):
        mask_np[k * Cout:(k + 1) * Cout, offs[k]:offs[k] + sizes[k]] = 1.0

    m_all = jnp.asarray(m_all_np)
    b_all = jnp.asarray(b_all_np)
    mask = jnp.asarray(mask_np)

    # Fold BatchNorm (running stats) into the conv weight and a bias that also
    # encodes the branch block-diagonal mask: own-branch columns carry the BN
    # shift, cross-branch / padded columns get -1e30 so ReLU zeroes them.
    scale = bn_gamma / jnp.sqrt(bn_var + BN_EPS)                 # (nb, Cout)
    shift = (bn_beta - bn_mean * scale).reshape(R, 1)            # (R, 1)
    w_all = (conv_w * scale[:, :, None]).reshape(R, C)           # (R, C)
    bias = jnp.where(mask > 0, shift, jnp.float32(-1e30))        # (R, SS_PAD)

    x_flat = x.reshape(N, C, HW)

    # --- tiling / VMEM budgets ----------------------------------------------
    budget = _vmem_budget_bytes()
    f32b = 4
    fixed_a = (2 * HW * SS_PAD + 2 * R * SS_PAD + 2 * R * SS_PAD) * f32b
    per_c = (2 * HW + 2 * HW + 2 * R) * f32b     # x in + passthrough out + W tile
    c_fit = max(128, (budget - fixed_a - (4 << 20)) // per_c)
    c_tile = _pick_tile(C, min(c_tile_cap or 1024, c_fit), 128)
    assert c_tile % 8 == 0, "channel tile must be sublane-aligned"
    n_ct = C // c_tile
    vmem_a = int(min(budget, max(32 << 20, fixed_a + per_c * c_tile + (4 << 20))))

    # TODO(synk): for N >= 4 a small batch tile per grid step would stop W_all
    # being re-streamed once per image (only matters for large C and big N).

    out_pass, z = pl.pallas_call(
        _psp_reduce_kernel,
        out_shape=(jax.ShapeDtypeStruct((N, C + R, HW), jnp.float32),
                   jax.ShapeDtypeStruct((N, R, SS_PAD), jnp.float32)),
        grid_spec=pltpu.PrefetchScalarGridSpec(
            num_scalar_prefetch=0,
            grid=(N, n_ct),
            in_specs=[
                pl.BlockSpec((1, c_tile, HW), lambda n, c: (n, c, 0)),    # x
                pl.BlockSpec((HW, SS_PAD), lambda n, c: (0, 0)),          # M_all
                pl.BlockSpec((R, c_tile), lambda n, c: (0, c)),           # W_all
                pl.BlockSpec((R, SS_PAD), lambda n, c: (0, 0)),           # bias
            ],
            out_specs=[
                pl.BlockSpec((1, c_tile, HW), lambda n, c: (n, c, 0)),    # passthrough
                pl.BlockSpec((1, R, SS_PAD), lambda n, c: (n, 0, 0)),     # z (resident acc)
            ],
        ),
        compiler_params=pltpu.CompilerParams(
            dimension_semantics=("parallel", "arbitrary"),
            vmem_limit_bytes=vmem_a,
        ),
    )(x_flat, m_all, w_all, bias)

    # --- expansion: feats = z @ B_all, tiled, written into the same buffer ---
    r_tile = _pick_tile(R, min(r_tile_cap or 256, R), 8)
    hw_tile = _pick_tile(HW, min(hw_tile_cap or 512, HW), 128)
    assert r_tile % 8 == 0, "row tile must be sublane-aligned"
    n_r = R // r_tile
    n_hw = HW // hw_tile
    c_blocks = C // r_tile               # feature channels start at block C//r_tile

    per_b = (2 * r_tile * SS_PAD + 2 * SS_PAD * hw_tile + 2 * r_tile * hw_tile) * f32b
    vmem_b = int(min(budget, max(32 << 20, per_b + (4 << 20))))

    out_full = pl.pallas_call(
        _psp_expand_kernel,
        out_shape=jax.ShapeDtypeStruct((N, C + R, HW), jnp.float32),
        grid_spec=pltpu.PrefetchScalarGridSpec(
            num_scalar_prefetch=0,
            grid=(N, n_hw, n_r),
            in_specs=[
                pl.BlockSpec((1, r_tile, SS_PAD), lambda n, h, r: (n, r, 0)),  # z
                pl.BlockSpec((SS_PAD, hw_tile), lambda n, h, r: (0, h)),       # B_all
                pl.BlockSpec(memory_space=pl.ANY),                             # aliased out
            ],
            out_specs=pl.BlockSpec((1, r_tile, hw_tile),
                                   lambda n, h, r: (n, c_blocks + r, h)),
        ),
        input_output_aliases={2: 0},
        compiler_params=pltpu.CompilerParams(
            dimension_semantics=("parallel", "parallel", "parallel"),
            vmem_limit_bytes=vmem_b,
        ),
    )(z, b_all, out_pass)

    return out_full.reshape(N, C + R, H, W)


# ----------------------------------------------------------------------------
# Pure-JAX reference (mirrors the PyTorch forward) for correctness checking.
# ----------------------------------------------------------------------------
def pyramid_pooling_ref(x, conv_w, bn_gamma, bn_beta, bn_mean, bn_var):
    N, C, H, W = x.shape
    feats = [x]
    for k, S in enumerate(POOL_SIZES):
        Ph = jnp.asarray(adaptive_pool_matrix(H, S))
        Pw = jnp.asarray(adaptive_pool_matrix(W, S))
        Uh = jnp.asarray(upsample_matrix(H, S))
        Uw = jnp.asarray(upsample_matrix(W, S))
        pooled = jnp.einsum('nchw,oh,pw->ncop', x, Ph, Pw)
        z = jnp.einsum('dc,ncop->ndop', conv_w[k], pooled)
        sc = (bn_gamma[k] / jnp.sqrt(bn_var[k] + BN_EPS))[None, :, None, None]
        sh = (bn_beta[k] - bn_mean[k] * bn_gamma[k] / jnp.sqrt(bn_var[k] + BN_EPS))[None, :, None, None]
        z = jnp.maximum(z * sc + sh, 0.0)
        feats.append(jnp.einsum('ndop,ho,wp->ndhw', z, Uh, Uw))
    return jnp.concatenate(feats, axis=1)


if __name__ == "__main__":
    def run_case(N, C, H, W, **caps):
        key = jax.random.PRNGKey(0)
        k_x, k_w, k_g, k_b, k_m, k_v = jax.random.split(key, 6)
        nb = len(POOL_SIZES)
        Cout = C // 4
        x = jax.random.normal(k_x, (N, C, H, W), dtype=jnp.float32)
        conv_w = jax.random.normal(k_w, (nb, Cout, C), dtype=jnp.float32) * 0.1
        bn_gamma = jax.random.uniform(k_g, (nb, Cout), minval=0.5, maxval=1.5)
        bn_beta = jax.random.normal(k_b, (nb, Cout)) * 0.1
        bn_mean = jax.random.normal(k_m, (nb, Cout)) * 0.1
        bn_var = jax.random.uniform(k_v, (nb, Cout), minval=0.5, maxval=1.5)

        out = jax.block_until_ready(
            pyramid_pooling(x, conv_w, bn_gamma, bn_beta, bn_mean, bn_var, **caps))
        ref = pyramid_pooling_ref(x, conv_w, bn_gamma, bn_beta, bn_mean, bn_var)
        assert out.shape == (N, C + nb * Cout, H, W), out.shape
        assert np.allclose(np.asarray(out), np.asarray(ref), rtol=1e-3, atol=1e-3), \
            f"kernel does not match reference for shape {(N, C, H, W)} caps={caps}"

    # Small default-path case (single channel tile, single r/hw tile).
    run_case(2, 16, 16, 16)
    # Multi-tile case: exercises the channel-axis accumulation, the tiled
    # (r, hw) expansion and the aliased passthrough region surviving kernel B.
    run_case(2, 256, 16, 16, c_tile_cap=128, r_tile_cap=64, hw_tile_cap=128)

    print("KERNEL_OK")
</pallas_src>

<mosaic_0001>
module attributes {stable_mosaic.version = 11 : i64} {
  func.func @_psp_expand_kernel(%arg0: i32, %arg1: i32, %arg2: i32, %arg3: memref<1x16x128xf32, #tpu.memory_space<vmem>>, %arg4: memref<128x256xf32, #tpu.memory_space<vmem>>, %arg5: memref<2x32x256xf32, #tpu.memory_space<any>>, %arg6: memref<1x16x256xf32, #tpu.memory_space<vmem>>) attributes {dimension_semantics = [#tpu.dimension_semantics<parallel>, #tpu.dimension_semantics<parallel>, #tpu.dimension_semantics<parallel>], iteration_bounds = array<i64: 2, 1, 1>, scalar_prefetch = 0 : i64, scratch_operands = 0 : i64, tpu.core_type = #tpu.core_type<tc>, window_params = [{transform_indices = @transform_0, window_bounds = array<i64: 1, 16, 128>}, {transform_indices = @transform_1, window_bounds = array<i64: 128, 256>}, {}, {transform_indices = @transform_3, window_bounds = array<i64: 1, 16, 256>}]} {
    %c0 = arith.constant 0 : index
    %c0_0 = arith.constant 0 : index
    %c0_1 = arith.constant 0 : index
    %0 = vector.load %arg3[%c0, %c0_0, %c0_1] : memref<1x16x128xf32, #tpu.memory_space<vmem>>, vector<1x16x128xf32>
    %1 = vector.shape_cast %0 : vector<1x16x128xf32> to vector<16x128xf32>
    %c0_2 = arith.constant 0 : index
    %c0_3 = arith.constant 0 : index
    %2 = vector.load %arg4[%c0_2, %c0_3] : memref<128x256xf32, #tpu.memory_space<vmem>>, vector<128x256xf32>
    %cst = arith.constant dense<0.000000e+00> : vector<16x256xf32>
    %3 = tpu.matmul %1, %2, %cst {dimension_numbers = #tpu.dot_dimension_numbers<[1], [0], [0], [1], [0, 0, 1, 1], [], []>} : vector<16x128xf32>, vector<128x256xf32>, vector<16x256xf32> -> vector<16x256xf32>
    %c0_4 = arith.constant 0 : index
    %c0_5 = arith.constant 0 : index
    %c0_6 = arith.constant 0 : index
    %4 = vector.load %arg6[%c0_4, %c0_5, %c0_6] : memref<1x16x256xf32, #tpu.memory_space<vmem>>, vector<1x16x256xf32>
    %5 = vector.shape_cast %4 : vector<1x16x256xf32> to vector<16x256xf32>
    %6 = vector.shape_cast %3 : vector<16x256xf32> to vector<1x16x256xf32>
    tpu.vector_store %arg6[%c0_4, %c0_5, %c0_6], %6 {strides = array<i32>} : memref<1x16x256xf32, #tpu.memory_space<vmem>>, vector<1x16x256xf32>,
    return
  }
  func.func @transform_0(%arg0: i32, %arg1: i32, %arg2: i32) -> (i32, i32, i32) {
    %c0_i32 = arith.constant 0 : i32
    %c0_i32_0 = arith.constant 0 : i32
    return %arg0, %arg2, %c0_i32 : i32, i32, i32
  }
  func.func @transform_1(%arg0: i32, %arg1: i32, %arg2: i32) -> (i32, i32) {
    %c0_i32 = arith.constant 0 : i32
    %c0_i32_0 = arith.constant 0 : i32
    return %c0_i32, %arg1 : i32, i32
  }
  func.func @transform_3(%arg0: i32, %arg1: i32, %arg2: i32) -> (i32, i32, i32) {
    %c1_i32 = arith.constant 1 : i32
    %0 = arith.addi %c1_i32, %arg2 : i32
    %c0_i32 = arith.constant 0 : i32
    return %arg0, %0, %arg1 : i32, i32, i32
  }
}

module attributes {stable_mosaic.version = 11 : i64} {
  func.func @_psp_reduce_kernel(%arg0: i32, %arg1: i32, %arg2: memref<1x16x256xf32, #tpu.memory_space<vmem>>, %arg3: memref<256x128xf32, #tpu.memory_space<vmem>>, %arg4: memref<16x16xf32, #tpu.memory_space<vmem>>, %arg5: memref<16x128xf32, #tpu.memory_space<vmem>>, %arg6: memref<1x16x256xf32, #tpu.memory_space<vmem>>, %arg7: memref<1x16x128xf32, #tpu.memory_space<vmem>>) attributes {dimension_semantics = [#tpu.dimension_semantics<parallel>, #tpu.dimension_semantics<arbitrary>], iteration_bounds = array<i64: 2, 1>, scalar_prefetch = 0 : i64, scratch_operands = 0 : i64, tpu.core_type = #tpu.core_type<tc>, window_params = [{transform_indices = @transform_0, window_bounds = array<i64: 1, 16, 256>}, {pipeline_mode = #tpu.pipeline_mode<synchronous>, transform_indices = @transform_1, window_bounds = array<i64: 256, 128>}, {transform_indices = @transform_2, window_bounds = array<i64: 16, 16>}, {pipeline_mode = #tpu.pipeline_mode<synchronous>, transform_indices = @transform_3, window_bounds = array<i64: 16, 128>}, {transform_indices = @transform_4, window_bounds = array<i64: 1, 16, 256>}, {transform_indices = @transform_5, window_bounds = array<i64: 1, 16, 128>}]} {
    %c0_i32 = arith.constant 0 : i32
    %0 = arith.cmpi eq, %arg1, %c0_i32 : i32
    %1 = arith.extui %0 : i1 to i32
    %c0_i32_0 = arith.constant 0 : i32
    %2 = arith.cmpi ne, %1, %c0_i32_0 : i32
    scf.if %2 {
      %cst_19 = arith.constant 0.000000e+00 : f32
      %21 = vector.broadcast %cst_19 : f32 to vector<1x16x128xf32>
      %c0_20 = arith.constant 0 : index
      %c0_21 = arith.constant 0 : index
      %c0_22 = arith.constant 0 : index
      %22 = vector.load %arg7[%c0_20, %c0_21, %c0_22] : memref<1x16x128xf32, #tpu.memory_space<vmem>>, vector<1x16x128xf32>
      tpu.vector_store %arg7[%c0_20, %c0_21, %c0_22], %21 {strides = array<i32>} : memref<1x16x128xf32, #tpu.memory_space<vmem>>, vector<1x16x128xf32>,
    } else {
    }
    %c0 = arith.constant 0 : index
    %c0_1 = arith.constant 0 : index
    %c0_2 = arith.constant 0 : index
    %3 = vector.load %arg2[%c0, %c0_1, %c0_2] : memref<1x16x256xf32, #tpu.memory_space<vmem>>, vector<1x16x256xf32>
    %4 = vector.shape_cast %3 : vector<1x16x256xf32> to vector<16x256xf32>
    %c0_3 = arith.constant 0 : index
    %c0_4 = arith.constant 0 : index
    %c0_5 = arith.constant 0 : index
    %5 = vector.load %arg6[%c0_3, %c0_4, %c0_5] : memref<1x16x256xf32, #tpu.memory_space<vmem>>, vector<1x16x256xf32>
    %6 = vector.shape_cast %5 : vector<1x16x256xf32> to vector<16x256xf32>
    %7 = vector.shape_cast %4 : vector<16x256xf32> to vector<1x16x256xf32>
    tpu.vector_store %arg6[%c0_3, %c0_4, %c0_5], %7 {strides = array<i32>} : memref<1x16x256xf32, #tpu.memory_space<vmem>>, vector<1x16x256xf32>,
    %c0_6 = arith.constant 0 : index
    %c0_7 = arith.constant 0 : index
    %8 = vector.load %arg3[%c0_6, %c0_7] : memref<256x128xf32, #tpu.memory_space<vmem>>, vector<256x128xf32>
    %cst = arith.constant dense<0.000000e+00> : vector<16x128xf32>
    %9 = tpu.matmul %4, %8, %cst {dimension_numbers = #tpu.dot_dimension_numbers<[1], [0], [0], [1], [0, 0, 1, 1], [], []>} : vector<16x256xf32>, vector<256x128xf32>, vector<16x128xf32> -> vector<16x128xf32>
    %c0_8 = arith.constant 0 : index
    %c0_9 = arith.constant 0 : index
    %c0_10 = arith.constant 0 : index
    %10 = vector.load %arg7[%c0_8, %c0_9, %c0_10] : memref<1x16x128xf32, #tpu.memory_space<vmem>>, vector<1x16x128xf32>
    %11 = vector.shape_cast %10 : vector<1x16x128xf32> to vector<16x128xf32>
    %c0_11 = arith.constant 0 : index
    %c0_12 = arith.constant 0 : index
    %12 = vector.load %arg4[%c0_11, %c0_12] : memref<16x16xf32, #tpu.memory_space<vmem>>, vector<16x16xf32>
    %cst_13 = arith.constant dense<0.000000e+00> : vector<16x128xf32>
    %13 = tpu.matmul %12, %9, %cst_13 {dimension_numbers = #tpu.dot_dimension_numbers<[1], [0], [0], [1], [0, 0, 1, 1], [], []>} : vector<16x16xf32>, vector<16x128xf32>, vector<16x128xf32> -> vector<16x128xf32>
    %14 = arith.addf %11, %13 : vector<16x128xf32>
    %c0_14 = arith.constant 0 : index
    %c0_15 = arith.constant 0 : index
    %c0_16 = arith.constant 0 : index
    %15 = vector.load %arg7[%c0_14, %c0_15, %c0_16] : memref<1x16x128xf32, #tpu.memory_space<vmem>>, vector<1x16x128xf32>
    %16 = vector.shape_cast %15 : vector<1x16x128xf32> to vector<16x128xf32>
    %17 = vector.shape_cast %14 : vector<16x128xf32> to vector<1x16x128xf32>
    tpu.vector_store %arg7[%c0_14, %c0_15, %c0_16], %17 {strides = array<i32>} : memref<1x16x128xf32, #tpu.memory_space<vmem>>, vector<1x16x128xf32>,
    %c0_i32_17 = arith.constant 0 : i32
    %18 = arith.cmpi eq, %arg1, %c0_i32_17 : i32
    %19 = arith.extui %18 : i1 to i32
    %c0_i32_18 = arith.constant 0 : i32
    %20 = arith.cmpi ne, %19, %c0_i32_18 : i32
    scf.if %20 {
      %c0_19 = arith.constant 0 : index
      %c0_20 = arith.constant 0 : index
      %c0_21 = arith.constant 0 : index
      %21 = vector.load %arg7[%c0_19, %c0_20, %c0_21] : memref<1x16x128xf32, #tpu.memory_space<vmem>>, vector<1x16x128xf32>
      %22 = vector.shape_cast %21 : vector<1x16x128xf32> to vector<16x128xf32>
      %c0_22 = arith.constant 0 : index
      %c0_23 = arith.constant 0 : index
      %23 = vector.load %arg5[%c0_22, %c0_23] : memref<16x128xf32, #tpu.memory_space<vmem>>, vector<16x128xf32>
      %24 = arith.addf %22, %23 : vector<16x128xf32>
      %cst_24 = arith.constant 0.000000e+00 : f32
      %25 = vector.broadcast %cst_24 : f32 to vector<16x128xf32>
      %26 = arith.maximumf %24, %25 : vector<16x128xf32>
      %c0_25 = arith.constant 0 : index
      %c0_26 = arith.constant 0 : index
      %c0_27 = arith.constant 0 : index
      %27 = vector.load %arg7[%c0_25, %c0_26, %c0_27] : memref<1x16x128xf32, #tpu.memory_space<vmem>>, vector<1x16x128xf32>
      %28 = vector.shape_cast %27 : vector<1x16x128xf32> to vector<16x128xf32>
      %29 = vector.shape_cast %26 : vector<16x128xf32> to vector<1x16x128xf32>
      tpu.vector_store %arg7[%c0_25, %c0_26, %c0_27], %29 {strides = array<i32>} : memref<1x16x128xf32, #tpu.memory_space<vmem>>, vector<1x16x128xf32>,
    } else {
    }
    return
  }
  func.func @transform_0(%arg0: i32, %arg1: i32) -> (i32, i32, i32) {
    %c0_i32 = arith.constant 0 : i32
    %c0_i32_0 = arith.constant 0 : i32
    return %arg0, %arg1, %c0_i32 : i32, i32, i32
  }
  func.func @transform_1(%arg0: i32, %arg1: i32) -> (i32, i32) {
    %c0_i32 = arith.constant 0 : i32
    %c0_i32_0 = arith.constant 0 : i32
    %c0_i32_1 = arith.constant 0 : i32
    return %c0_i32, %c0_i32_0 : i32, i32
  }
  func.func @transform_2(%arg0: i32, %arg1: i32) -> (i32, i32) {
    %c0_i32 = arith.constant 0 : i32
    %c0_i32_0 = arith.constant 0 : i32
    return %c0_i32, %arg1 : i32, i32
  }
  func.func @transform_3(%arg0: i32, %arg1: i32) -> (i32, i32) {
    %c0_i32 = arith.constant 0 : i32
    %c0_i32_0 = arith.constant 0 : i32
    %c0_i32_1 = arith.constant 0 : i32
    return %c0_i32, %c0_i32_0 : i32, i32
  }
  func.func @transform_4(%arg0: i32, %arg1: i32) -> (i32, i32, i32) {
    %c0_i32 = arith.constant 0 : i32
    %c0_i32_0 = arith.constant 0 : i32
    return %arg0, %arg1, %c0_i32 : i32, i32, i32
  }
  func.func @transform_5(%arg0: i32, %arg1: i32) -> (i32, i32, i32) {
    %c0_i32 = arith.constant 0 : i32
    %c0_i32_0 = arith.constant 0 : i32
    %c0_i32_1 = arith.constant 0 : i32
    return %arg0, %c0_i32, %c0_i32_0 : i32, i32, i32
  }
}

</mosaic_0001>

<bundles_post_ra>
// kernel: pyramid_pooling.3
= control target key start
LH: loop header
LB: loop body
LE: loop exit
PB: predicated region body
PF: predicated region fallthrough
CT: control target
= control target key end

     0   :  { %s591_s12 = smov 0   ;;  %s593_s13 = smov 0   ;;  %s728_s0 = inlined_call_operand.vmem [shape: f32[2,16,128], index: 0, kind: input, shape index: {}]   ;;  %s729_s1 = inlined_call_operand.vmem [shape: f32[128,256], index: 1, kind: input, shape index: {}]   ;;  %s730_s2 = inlined_call_operand.vmem [shape: f32[2,32,256], index: 2, kind: input, shape index: {}, may-alias: {2,3}]   ;;  %s731_s3 = inlined_call_operand.vmem [shape: f32[2,32,256], index: 3, kind: output, shape index: {}, may-alias: {2,3}]  }
   0x1   :  { %s595_s14 = smov 0  }
   0x2 LB: > { %s32_s2 = sadd.s32 1, %s564_s13  ;;  %p478_p0 = scmp.ge.s32.totalorder %s568_s14, 1  ;;  %s568_s14 = sphi %s595_s14, %s13_s14   ;;  %s564_s13 = sphi %s593_s13, %s733_s13   ;;  %s560_s12 = sphi %s591_s12, %s732_s12  }
   0x3   : > { %p34_p1 = scmp.ge.s32.totalorder %s32_s2, 2  ;;  %p156_p2 = scmp.lt.s32.totalorder %s568_s14, 3 }
   0x5   : > { %s735_s2 = smov (%p34_p1, %s32_s2), 0  ;;  %p157_p3 = pnand %p478_p0, %p156_p2 }
   0x6   : > { %p198_p4 = scmp.lt.s32.totalorder (!%p157_p3), %s560_s12, 1 }
   0x7   : > { %160 = sbr.rel (%p157_p3) target bundleno = 242 (0xf2), region = 28 }
   0xc   : > { %v264_v0 = vld [vmem:[%s729_s1 + $0xf8] sm:$0xff]  ;;  %v263_v1 = vld [vmem:[%s729_s1 + $0xf0] sm:$0xff]  ;;  %v262_v2 = vld [vmem:[%s729_s1 + $0xe8] sm:$0xff]  ;;  %s737_s12 = smov (!%p198_p4, %s560_s12), 1  ;;  %v570_v34 = vmov 0.0  }
   0xd   : > { %265 = vmatprep.subr.mxu0 %v264_v0  ;;  %489 = vmatprep.subr.mxu1 %v264_v0  ;;  %v261_v3 = vld [vmem:[%s729_s1 + $0xe0] sm:$0xff]  ;;  %v260_v4 = vld [vmem:[%s729_s1 + $0xd8] sm:$0xff]  ;;  %v259_v5 = vld [vmem:[%s729_s1 + $0xd0] sm:$0xff]  ;;  %s485_s23 = sshll.u32 %s737_s12, 4  ;;  %s488_s8 = sshll.u32 %s737_s12, 6 }
   0xe   : > { %266 = vmatpush1.msra.mxu0 %v263_v1  ;;  %505 = vmatpush1.msra.mxu1 %v263_v1  ;;  %v258_v6 = vld [vmem:[%s729_s1 + $0xc8] sm:$0xff]  ;;  %v257_v7 = vld [vmem:[%s729_s1 + $0xc0] sm:$0xff]  ;;  %v256_v8 = vld [vmem:[%s729_s1 + $0xb8] sm:$0xff]  ;;  %s205_s5 = scalar_lea.vmem %s728_s0, %s485_s23  ;;  %s487_s9 = sadd.s32 32, %s488_s8 }
   0xf   : > { %267 = vmatprep.subr.mxu0 %v262_v2  ;;  %490 = vmatprep.subr.mxu1 %v262_v2  ;;  %v255_v9 = vld [vmem:[%s729_s1 + $0xb0] sm:$0xff]  ;;  %v254_v10 = vld [vmem:[%s729_s1 + $0xa8] sm:$0xff]  ;;  %v253_v11 = vld [vmem:[%s729_s1 + $0xa0] sm:$0xff]  ;;  %s227_s15 = scalar_lea.vmem %s731_s3, %s487_s9 }
  0x10   : > { %268 = vmatpush1.msra.mxu0 %v261_v3  ;;  %506 = vmatpush1.msra.mxu1 %v261_v3  ;;  %v252_v12 = vld [vmem:[%s729_s1 + $0x98] sm:$0xff]  ;;  %v251_v13 = vld [vmem:[%s729_s1 + $0x90] sm:$0xff]  ;;  %v250_v14 = vld [vmem:[%s729_s1 + $0x88] sm:$0xff] }
  0x11   : > { %269 = vmatprep.subr.mxu0 %v260_v4  ;;  %491 = vmatprep.subr.mxu1 %v260_v4  ;;  %v249_v15 = vld [vmem:[%s729_s1 + $0x80] sm:$0xff]  ;;  %v248_v16 = vld [vmem:[%s729_s1 + $0x78] sm:$0xff]  ;;  %v247_v17 = vld [vmem:[%s729_s1 + $0x70] sm:$0xff] }
  0x12   : > { %270 = vmatpush1.msra.mxu0 %v259_v5  ;;  %507 = vmatpush1.msra.mxu1 %v259_v5  ;;  %v246_v18 = vld [vmem:[%s729_s1 + $0x68] sm:$0xff]  ;;  %v245_v19 = vld [vmem:[%s729_s1 + $0x60] sm:$0xff]  ;;  %v244_v20 = vld [vmem:[%s729_s1 + $0x58] sm:$0xff] }
  0x13   : > { %271 = vmatprep.subr.mxu0 %v258_v6  ;;  %492 = vmatprep.subr.mxu1 %v258_v6  ;;  %v243_v21 = vld [vmem:[%s729_s1 + $0x50] sm:$0xff]  ;;  %v242_v22 = vld [vmem:[%s729_s1 + $0x48] sm:$0xff]  ;;  %v241_v23 = vld [vmem:[%s729_s1 + $0x40] sm:$0xff] }
  0x14   : > { %272 = vmatpush1.msra.mxu0 %v257_v7  ;;  %508 = vmatpush1.msra.mxu1 %v257_v7  ;;  %v240_v24 = vld [vmem:[%s729_s1 + $0x38] sm:$0xff]  ;;  %v239_v25 = vld [vmem:[%s729_s1 + $0x30] sm:$0xff]  ;;  %v238_v26 = vld [vmem:[%s729_s1 + $0x28] sm:$0xff] }
  0x15   : > { %273 = vmatprep.subr.mxu0 %v256_v8  ;;  %493 = vmatprep.subr.mxu1 %v256_v8  ;;  %v237_v27 = vld [vmem:[%s729_s1 + $0x20] sm:$0xff]  ;;  %v236_v28 = vld [vmem:[%s729_s1 + $0x18] sm:$0xff]  ;;  %v235_v29 = vld [vmem:[%s729_s1 + $0x10] sm:$0xff] }
  0x16   : > { %274 = vmatpush1.msra.mxu0 %v255_v9  ;;  %509 = vmatpush1.msra.mxu1 %v255_v9  ;;  %v234_v30 = vld [vmem:[%s729_s1 + $0x8] sm:$0xff]  ;;  %v233_v31 = vld [vmem:[%s729_s1] sm:$0xff] }
  0x17   : > { %275 = vmatprep.subr.mxu0 %v254_v10  ;;  %494 = vmatprep.subr.mxu1 %v254_v10  ;;  %v231_v32 = vld [vmem:[%s205_s5] sm:$0xff]  ;;  %v232_v33 = vld [vmem:[%s205_s5 + $0x8] sm:$0xff] }
  0x18   : > { %276 = vmatpush1.msra.mxu0 %v253_v11  ;;  %510 = vmatpush1.msra.mxu1 %v253_v11 }
  0x19   : > { %277 = vmatprep.subr.mxu0 %v252_v12  ;;  %495 = vmatprep.subr.mxu1 %v252_v12 }
  0x1a   : > { %278 = vmatpush1.msra.mxu0 %v251_v13  ;;  %511 = vmatpush1.msra.mxu1 %v251_v13 }
  0x1b   : > { %279 = vmatprep.subr.mxu0 %v250_v14  ;;  %496 = vmatprep.subr.mxu1 %v250_v14 }
  0x1c   : > { %280 = vmatpush1.msra.mxu0 %v249_v15  ;;  %512 = vmatpush1.msra.mxu1 %v249_v15 }
  0x1d   : > { %281 = vmatprep.subr.mxu0 %v248_v16  ;;  %497 = vmatprep.subr.mxu1 %v248_v16 }
  0x1e   : > { %282 = vmatpush1.msra.mxu0 %v247_v17  ;;  %513 = vmatpush1.msra.mxu1 %v247_v17 }
  0x1f   : > { %283 = vmatprep.subr.mxu0 %v246_v18  ;;  %498 = vmatprep.subr.mxu1 %v246_v18 }
  0x20   : > { %284 = vmatpush1.msra.mxu0 %v245_v19  ;;  %514 = vmatpush1.msra.mxu1 %v245_v19 }
  0x21   : > { %285 = vmatprep.subr.mxu0 %v244_v20  ;;  %499 = vmatprep.subr.mxu1 %v244_v20 }
  0x22   : > { %286 = vmatpush1.msra.mxu0 %v243_v21  ;;  %515 = vmatpush1.msra.mxu1 %v243_v21 }
  0x23   : > { %287 = vmatprep.subr.mxu0 %v242_v22  ;;  %500 = vmatprep.subr.mxu1 %v242_v22 }
  0x24   : > { %288 = vmatpush1.msra.mxu0 %v241_v23  ;;  %516 = vmatpush1.msra.mxu1 %v241_v23 }
  0x25   : > { %289 = vmatprep.subr.mxu0 %v240_v24  ;;  %501 = vmatprep.subr.mxu1 %v240_v24 }
  0x26   : > { %290 = vmatpush1.msra.mxu0 %v239_v25  ;;  %517 = vmatpush1.msra.mxu1 %v239_v25 }
  0x27   : > { %291 = vmatprep.subr.mxu0 %v238_v26  ;;  %502 = vmatprep.subr.mxu1 %v238_v26 }
  0x28   : > { %292 = vmatpush1.msra.mxu0 %v237_v27  ;;  %518 = vmatpush1.msra.mxu1 %v237_v27 }
  0x29   : > { %293 = vmatprep.subr.mxu0 %v236_v28  ;;  %503 = vmatprep.subr.mxu1 %v236_v28 }
  0x2a   : > { %294 = vmatpush1.msra.mxu0 %v235_v29  ;;  %519 = vmatpush1.msra.mxu1 %v235_v29 }
  0x2b   : > { %295 = vmatprep.subr.mxu0 %v234_v30  ;;  %504 = vmatprep.subr.mxu1 %v234_v30 }
  0x2c   : > { %296 = vmatpush1.msra.mxu0 %v233_v31  ;;  %520 = vmatpush1.msra.mxu1 %v233_v31 }
  0x2d   : > { %329 = vmatprep.mubr.f32.mxu0 %v570_v34  ;;  %335 = vmatprep.mubr.f32.mxu1 %v570_v34 }
  0x2e   : > { %330 = vmatmul.mubr.f32.vlgmr.msra.gmra.mxu0 %v231_v32  ;;  %336 = vmatmul.mubr.f32.vlgmr.msra.gmra.mxu1 %v232_v33 }
  0xee   : > { %v331_v35 = vpop.f32.mrf.mxu0  ;;  %v337_v36 = vpop.f32.mrf.mxu1 }
  0xef   : > { %342 = vst [vmem:[%s227_s15] sm:$0xff] %v331_v35  ;;  %344 = vst [vmem:[%s227_s15 + $0x10] sm:$0xff] %v337_v36 }
  0xf0   : > { %v333_v37 = vpop.f32.mrf.mxu0  ;;  %v339_v38 = vpop.f32.mrf.mxu1 }
  0xf1   : > { %343 = vst [vmem:[%s227_s15 + $0x8] sm:$0xff] %v333_v37  ;;  %345 = vst [vmem:[%s227_s15 + $0x18] sm:$0xff] %v339_v38 }
  0xf2 PF: > { %s13_s14 = sadd.s32 1, %s568_s14   ;;  %s732_s12 = smov %s564_s13 }
  0xf3   : > { %p10_p5 = scmp.ge.s32.totalorder %s13_s14, 4   ;;  %s733_s13 = smov %s735_s2 }
  0xf5   :  { %12 = sbr.rel (!%p10_p5) target bundleno = 2 (0x2), region = 61 }

// kernel: pyramid_pooling.2
= control target key start
LH: loop header
LB: loop body
LE: loop exit
PB: predicated region body
PF: predicated region fallthrough
CT: control target
= control target key end

     0   :  { %s814_s18 = smov 0   ;;  %s816_s19 = smov 0   ;;  %s963_s0 = inlined_call_operand.vmem [shape: f32[2,16,256], index: 0, kind: input, shape index: {}]   ;;  %s964_s1 = inlined_call_operand.vmem [shape: f32[256,128], index: 1, kind: input, shape index: {}]   ;;  %s965_s2 = inlined_call_operand.vmem [shape: f32[16,16], index: 2, kind: input, shape index: {}]   ;;  %s966_s3 = inlined_call_operand.vmem [shape: f32[16,128], index: 3, kind: input, shape index: {}]   ;;  %s967_s4 = inlined_call_operand.vmem [shape: f32[2,32,256], index: 4, kind: output, shape index: {0}]   ;;  %s968_s5 = inlined_call_operand.vmem [shape: f32[2,16,128], index: 5, kind: output, shape index: {1}]  }
   0x1   :  { %s818_s20 = smov 0  }
   0x2 LB: > { %s28_s21 = sadd.s32 1, %s778_s19  ;;  %p672_p0 = scmp.ge.s32.totalorder %s782_s20, 1  ;;  %s782_s20 = sphi %s818_s20, %s16_s20   ;;  %s778_s19 = sphi %s816_s19, %s970_s19   ;;  %s774_s18 = sphi %s814_s18, %s969_s18  }
   0x3   : > { %p30_p1 = scmp.ge.s32.totalorder %s28_s21, 2  ;;  %p221_p2 = scmp.lt.s32.totalorder %s782_s20, 3 }
   0x5   : > { %s972_s21 = smov (%p30_p1, %s28_s21), 0  ;;  %p222_p3 = pnand %p672_p0, %p221_p2 }
   0x6   : > { %p269_p4 = scmp.lt.s32.totalorder (!%p222_p3), %s774_s18, 1 }
   0x7   : > { %225 = sbr.rel (%p222_p3) target bundleno = 450 (0x1c2), region = 36 }
   0xc   : > { %v344_v0 = vld [vmem:[%s964_s1 + $0xf8] sm:$0xff]  ;;  %v343_v2 = vld [vmem:[%s964_s1 + $0xf0] sm:$0xff]  ;;  %v342_v4 = vld [vmem:[%s964_s1 + $0xe8] sm:$0xff]  ;;  %s974_s18 = smov (!%p269_p4, %s774_s18), 1  ;;  %vm424_vm0 = vcmask 130048  }
   0xd   : > { %v328_v1 = vld [vmem:[%s964_s1 + $0x78] sm:$0xff]  ;;  %686 = vmatprep.subr.mxu0 %v344_v0  ;;  %v327_v3 = vld [vmem:[%s964_s1 + $0x70] sm:$0xff]  ;;  %v326_v5 = vld [vmem:[%s964_s1 + $0x68] sm:$0xff]  ;;  %s683_s11 = sshll.u32 %s974_s18, 5  ;;  %s684_s14 = sshll.u32 %s974_s18, 6 }
   0xe   : > { %687 = vmatpush3.msra.mxu0 %v328_v1  ;;  %v341_v6 = vld [vmem:[%s964_s1 + $0xe0] sm:$0xff]  ;;  %v340_v8 = vld [vmem:[%s964_s1 + $0xd8] sm:$0xff]  ;;  %s277_s25 = scalar_lea.vmem %s963_s0, %s683_s11  ;;  %v339_v10 = vld [vmem:[%s964_s1 + $0xd0] sm:$0xff]  ;;  %s292_s30 = scalar_lea.vmem %s967_s4, %s684_s14 }
   0xf   : > { %688 = vmatprep.subr.mxu0 %v343_v2  ;;  %v325_v7 = vld [vmem:[%s964_s1 + $0x60] sm:$0xff]  ;;  %v324_v9 = vld [vmem:[%s964_s1 + $0x58] sm:$0xff]  ;;  %v323_v11 = vld [vmem:[%s964_s1 + $0x50] sm:$0xff]  ;;  %s685_s12 = sshll.u32 %s974_s18, 4 }
  0x10   : > { %689 = vmatpush3.msra.mxu0 %v327_v3  ;;  %v338_v12 = vld [vmem:[%s964_s1 + $0xc8] sm:$0xff]  ;;  %v305_v15 = vld [vmem:[%s277_s25] sm:$0xff]  ;;  %v308_v16 = vld [vmem:[%s277_s25 + $0x18] sm:$0xff]  ;;  %s298_s17 = scalar_lea.vmem %s968_s5, %s685_s12 }
  0x11   : > { %690 = vmatprep.subr.mxu0 %v342_v4  ;;  %v322_v13 = vld [vmem:[%s964_s1 + $0x48] sm:$0xff]  ;;  %v307_v17 = vld [vmem:[%s277_s25 + $0x10] sm:$0xff]  ;;  %v337_v18 = vld [vmem:[%s964_s1 + $0xc0] sm:$0xff]  ;;  %309 = vst [vmem:[%s292_s30] sm:$0xff] %v305_v15 }
  0x12   : > { %691 = vmatpush3.msra.mxu0 %v326_v5  ;;  %v306_v14 = vld [vmem:[%s277_s25 + $0x8] sm:$0xff]  ;;  %312 = vst [vmem:[%s292_s30 + $0x18] sm:$0xff] %v308_v16  ;;  %311 = vst [vmem:[%s292_s30 + $0x10] sm:$0xff] %v307_v17  ;;  %v321_v19 = vld [vmem:[%s964_s1 + $0x40] sm:$0xff] }
  0x13   : > { %692 = vmatprep.subr.mxu0 %v341_v6  ;;  %310 = vst [vmem:[%s292_s30 + $0x8] sm:$0xff] %v306_v14  ;;  %409 = vmatprep.mubr.f32.mxu0 %v306_v14  ;;  %v336_v20 = vld [vmem:[%s964_s1 + $0xb8] sm:$0xff]  ;;  %v335_v22 = vld [vmem:[%s964_s1 + $0xb0] sm:$0xff]  ;;  %v334_v24 = vld [vmem:[%s964_s1 + $0xa8] sm:$0xff] }
  0x14   : > { %693 = vmatpush3.msra.mxu0 %v325_v7  ;;  %v320_v21 = vld [vmem:[%s964_s1 + $0x38] sm:$0xff]  ;;  %v319_v23 = vld [vmem:[%s964_s1 + $0x30] sm:$0xff]  ;;  %v318_v25 = vld [vmem:[%s964_s1 + $0x28] sm:$0xff] }
  0x15   : > { %694 = vmatprep.subr.mxu0 %v340_v8  ;;  %v333_v26 = vld [vmem:[%s964_s1 + $0xa0] sm:$0xff]  ;;  %v332_v28 = vld [vmem:[%s964_s1 + $0x98] sm:$0xff]  ;;  %v331_v30 = vld [vmem:[%s964_s1 + $0x90] sm:$0xff] }
  0x16   : > { %695 = vmatpush3.msra.mxu0 %v324_v9  ;;  %v317_v27 = vld [vmem:[%s964_s1 + $0x20] sm:$0xff]  ;;  %v316_v29 = vld [vmem:[%s964_s1 + $0x18] sm:$0xff]  ;;  %v315_v31 = vld [vmem:[%s964_s1 + $0x10] sm:$0xff] }
  0x17   : > { %696 = vmatprep.subr.mxu0 %v339_v10  ;;  %v330_v32 = vld [vmem:[%s964_s1 + $0x88] sm:$0xff]  ;;  %v329_v34 = vld [vmem:[%s964_s1 + $0x80] sm:$0xff] }
  0x18   : > { %697 = vmatpush3.msra.mxu0 %v323_v11  ;;  %v314_v33 = vld [vmem:[%s964_s1 + $0x8] sm:$0xff]  ;;  %v313_v35 = vld [vmem:[%s964_s1] sm:$0xff] }
  0x19   : > { %698 = vmatprep.subr.mxu0 %v338_v12  ;;  %v422_v36 = vld [vmem:[%s965_s2] sm:$0xff]  ;;  %v423_v43 = vld [vmem:[%s965_s2 + $0x8] sm:$0xff] }
  0x1a   : > { %699 = vmatpush3.msra.mxu0 %v322_v13  ;;  %732 = vmatprep.mubr.msk.f32.mxu1 %vm424_vm0, %v422_v36  ;;  %v516_v45 = vld [vmem:[%s966_s3 + $0x8] sm:$0xff]  ;;  %v515_v47 = vld [vmem:[%s966_s3] sm:$0xff] }
  0x1b   : > { %700 = vmatprep.subr.mxu0 %v337_v18 }
  0x1c   : > { %701 = vmatpush3.msra.mxu0 %v321_v19 }
  0x1d   : > { %702 = vmatprep.subr.mxu0 %v336_v20 }
  0x1e   : > { %703 = vmatpush3.msra.mxu0 %v320_v21 }
  0x1f   : > { %704 = vmatprep.subr.mxu0 %v335_v22 }
  0x20   : > { %705 = vmatpush3.msra.mxu0 %v319_v23 }
  0x21   : > { %706 = vmatprep.subr.mxu0 %v334_v24 }
  0x22   : > { %707 = vmatpush3.msra.mxu0 %v318_v25 }
  0x23   : > { %708 = vmatprep.subr.mxu0 %v333_v26 }
  0x24   : > { %709 = vmatpush3.msra.mxu0 %v317_v27 }
  0x25   : > { %710 = vmatprep.subr.mxu0 %v332_v28 }
  0x26   : > { %711 = vmatpush3.msra.mxu0 %v316_v29 }
  0x27   : > { %712 = vmatprep.subr.mxu0 %v331_v30 }
  0x28   : > { %713 = vmatpush3.msra.mxu0 %v315_v31 }
  0x29   : > { %714 = vmatprep.subr.mxu0 %v330_v32 }
  0x2a   : > { %715 = vmatpush3.msra.mxu0 %v314_v33 }
  0x2b   : > { %716 = vmatprep.subr.mxu0 %v329_v34 }
  0x2c   : > { %717 = vmatpush3.msra.mxu0 %v313_v35 }
  0x2d   : > { %410 = vmatmul.mubr.f32.vlgmr.msra.gmra.mxu0 %v305_v15 }
  0x2e   : > { %414 = vmatprep.mubr.f32.mxu0 %v308_v16 }
  0x31   : > { %415 = vmatmul.mubr.f32.gmra.mxu0 %v307_v17 }
  0xed   : > { %v718_v37 = vpop.f32.mrf.mxu0 }
  0xef   : > { %v719_v38 = vpop.f32.mrf.mxu0 }
  0xf0   : > { %v720_v42 = vadd.f32 %v719_v38, %v718_v37 }
  0xf1   : > { %v721_v39 = vpop.f32.mrf.mxu0 }
  0xf3   : > { %v722_v40 = vpop.f32.mrf.mxu0 }
  0xf4   : > { %v723_v41 = vadd.f32 %v722_v40, %v721_v39 }
  0xf6   : > { %728 = vmatprep.subr.mxu1 %v723_v41 }
  0xf7   : > { %729 = vmatpush3.msra.mxu1 %v723_v41 }
  0xf8   : > { %730 = vmatprep.subr.mxu1 %v720_v42 }
  0xf9   : > { %731 = vmatpush3.msra.mxu1 %v720_v42 }
  0xfa   : > { %733 = vmatmul.mubr.msk.f32.vlgmr.msra.gmra.mxu1 %vm424_vm0, %v423_v43 }
 0x1ba   : > { %v734_v44 = vpop.f32.mrf.mxu1 }
 0x1bb   : > { %v518_v48 = vadd.f32 %v734_v44, %v516_v45 }
 0x1bc   : > { %v497_v46 = vpop.f32.mrf.mxu1 }
 0x1bd   : > { %v520_v49 = vmax.f32 %v518_v48, 0.0  ;;  %v517_v50 = vadd.f32 %v515_v47, %v497_v46 }
 0x1bf   : > { %522 = vst [vmem:[%s298_s17 + $0x8] sm:$0xff] %v520_v49  ;;  %v519_v51 = vmax.f32 %v517_v50, 0.0 }
 0x1c1   : > { %521 = vst [vmem:[%s298_s17] sm:$0xff] %v519_v51 }
 0x1c2 PF: > { %s16_s20 = sadd.s32 1, %s782_s20   ;;  %s969_s18 = smov %s778_s19 }
 0x1c3   : > { %p13_p5 = scmp.ge.s32.totalorder %s16_s20, 4   ;;  %s970_s19 = smov %s972_s21 }
 0x1c5   :  { %15 = sbr.rel (!%p13_p5) target bundleno = 2 (0x2), region = 89 }

</bundles_post_ra>
